<compile_context>
chip_gen: v7x
topology: tpu7x:2x2x1
jax: 0.10.0
libtpu: 0.0.40
codegen_flags: <defaults>
</compile_context>

<pallas_src>
import functools

import jax
import jax.numpy as jnp
from jax.experimental import pallas as pl
from jax.experimental.pallas import tpu as pltpu


def _round_up(v, m):
    return ((v + m - 1) // m) * m


def _ffn_kernel(x_ref, w1_ref, b1_ref, w2_ref, b2_ref, o_ref):
    # Two MXU matmuls + VPU bias add / ReLU, all on a (TM, S) row tile in VMEM.
    x = x_ref[...]
    h = jnp.dot(x, w1_ref[...], preferred_element_type=jnp.float32)
    h = jnp.maximum(h + b1_ref[...].astype(jnp.float32), 0.0)          # ReLU
    y = jnp.dot(h.astype(w2_ref.dtype), w2_ref[...],
                preferred_element_type=jnp.float32)
    y = y + b2_ref[...].astype(jnp.float32)
    o_ref[...] = y.astype(o_ref.dtype)


@functools.partial(jax.jit, static_argnames=("block_rows",))
def ffn_forward(x, w1, b1, w2, b2, *, block_rows=256):
    """x: [N, S]; w1, w2: [S, S] (in, out); b1, b2: [1, S]."""
    N, S = x.shape

    # Row-tile size: MXU-aligned (256) when N is large, otherwise the whole
    # (8-padded) row block so block_shape stays legal for tiny demo shapes.
    tm = min(block_rows, _round_up(N, 8))
    tm = _round_up(tm, 8)
    n_pad = _round_up(N, tm)
    if n_pad != N:
        x = jnp.pad(x, ((0, n_pad - N), (0, 0)))

    grid = (n_pad // tm,)

    # VMEM budget: resident weights/biases (x2 for pipeline buffers) + double-
    # buffered x/out row tiles + f32 intermediate headroom.  Capped at 64 MiB
    # so the request is always legal on v7x.
    wbytes = w1.dtype.itemsize
    xbytes = x.dtype.itemsize
    needed = (2 * 2 * S * S * wbytes          # w1, w2 (double-buffered)
              + 2 * 2 * S * b1.dtype.itemsize  # b1, b2
              + 2 * 2 * tm * S * xbytes        # x in + out tiles, double-buffered
              + 2 * tm * S * 4)                # f32 intermediates / slack
    vmem_limit = int(min(max(2 * needed, 32 << 20), 64 << 20))

    cost = pl.CostEstimate(
        flops=4 * N * S * S + 3 * N * S,
        transcendentals=0,
        bytes_accessed=2 * N * S * xbytes + 2 * S * S * wbytes
        + 2 * S * b1.dtype.itemsize,
    )

    out = pl.pallas_call(
        _ffn_kernel,
        out_shape=jax.ShapeDtypeStruct((n_pad, S), x.dtype),
        grid=grid,
        in_specs=[
            pl.BlockSpec((tm, S), lambda i: (i, 0)),   # x row tile
            pl.BlockSpec((S, S), lambda i: (0, 0)),    # w1 (VMEM-resident)
            pl.BlockSpec((1, S), lambda i: (0, 0)),    # b1
            pl.BlockSpec((S, S), lambda i: (0, 0)),    # w2 (VMEM-resident)
            pl.BlockSpec((1, S), lambda i: (0, 0)),    # b2
        ],
        out_specs=pl.BlockSpec((tm, S), lambda i: (i, 0)),
        compiler_params=pltpu.CompilerParams(
            dimension_semantics=("parallel",),
            vmem_limit_bytes=vmem_limit,
        ),
        cost_estimate=cost,
    )(x, w1, b1, w2, b2)

    return out[:N] if n_pad != N else out


def init_ffn_params(key, state_size, dtype=jnp.float32):
    """Deterministic init mimicking nn.Linear defaults (uniform +-1/sqrt(fan_in))."""
    k1, k2, k3, k4 = jax.random.split(key, 4)
    bound = 1.0 / (state_size ** 0.5)
    # stored as [in_features, out_features] == PyTorch weight.T
    w1 = jax.random.uniform(k1, (state_size, state_size), dtype, -bound, bound)
    b1 = jax.random.uniform(k2, (1, state_size), dtype, -bound, bound)
    w2 = jax.random.uniform(k3, (state_size, state_size), dtype, -bound, bound)
    b2 = jax.random.uniform(k4, (1, state_size), dtype, -bound, bound)
    return w1, b1, w2, b2


def _reference(x2d, w1, b1, w2, b2):
    return jnp.maximum(x2d @ w1 + b1, 0.0) @ w2 + b2


if __name__ == "__main__":
    key = jax.random.PRNGKey(0)

    # --- Test 1: small module-consistent shape (batch=2, seq=8, state=32) ---
    batch, seq, state_size = 2, 8, 32
    kx, kp, kx2, kp2 = jax.random.split(key, 4)
    x3d = jax.random.normal(kx, (batch, seq, state_size), jnp.float32)
    w1, b1, w2, b2 = init_ffn_params(kp, state_size)

    x2d = x3d.reshape(batch * seq, state_size)
    out = ffn_forward(x2d, w1, b1, w2, b2)
    out = out.reshape(batch, seq, state_size)
    jax.block_until_ready(out)

    ref = _reference(x2d, w1, b1, w2, b2).reshape(batch, seq, state_size)
    assert jnp.allclose(out, ref, atol=1e-5, rtol=1e-5), "small-shape mismatch"

    # --- Test 2: larger tiled shape exercising the multi-step row grid ------
    N2, S2 = 600, 128   # N not a multiple of the 256-row tile -> padded path
    xb = jax.random.normal(kx2, (N2, S2), jnp.float32)
    w1b, b1b, w2b, b2b = init_ffn_params(kp2, S2)

    outb = ffn_forward(xb, w1b, b1b, w2b, b2b)
    jax.block_until_ready(outb)

    refb = _reference(xb, w1b, b1b, w2b, b2b)
    assert outb.shape == (N2, S2)
    assert jnp.allclose(outb, refb, atol=1e-4, rtol=1e-4), "tiled-shape mismatch"

    print("KERNEL_OK")
</pallas_src>

<mosaic_0001>
module attributes {stable_mosaic.version = 11 : i64} {
  func.func @_ffn_kernel(%arg0: i32, %arg1: memref<16x32xf32, #tpu.memory_space<vmem>>, %arg2: memref<32x32xf32, #tpu.memory_space<vmem>>, %arg3: memref<1x32xf32, #tpu.memory_space<vmem>>, %arg4: memref<32x32xf32, #tpu.memory_space<vmem>>, %arg5: memref<1x32xf32, #tpu.memory_space<vmem>>, %arg6: memref<16x32xf32, #tpu.memory_space<vmem>>) attributes {dimension_semantics = [#tpu.dimension_semantics<parallel>], iteration_bounds = array<i64: 1>, scalar_prefetch = 0 : i64, scratch_operands = 0 : i64, tpu.core_type = #tpu.core_type<tc>, window_params = [{transform_indices = @transform_0, window_bounds = array<i64: 16, 32>}, {pipeline_mode = #tpu.pipeline_mode<synchronous>, transform_indices = @transform_1, window_bounds = array<i64: 32, 32>}, {pipeline_mode = #tpu.pipeline_mode<synchronous>, transform_indices = @transform_2, window_bounds = array<i64: 1, 32>}, {pipeline_mode = #tpu.pipeline_mode<synchronous>, transform_indices = @transform_3, window_bounds = array<i64: 32, 32>}, {pipeline_mode = #tpu.pipeline_mode<synchronous>, transform_indices = @transform_4, window_bounds = array<i64: 1, 32>}, {transform_indices = @transform_5, window_bounds = array<i64: 16, 32>}]} {
    %c0 = arith.constant 0 : index
    %c0_0 = arith.constant 0 : index
    %0 = vector.load %arg1[%c0, %c0_0] : memref<16x32xf32, #tpu.memory_space<vmem>>, vector<16x32xf32>
    %c0_1 = arith.constant 0 : index
    %c0_2 = arith.constant 0 : index
    %1 = vector.load %arg2[%c0_1, %c0_2] : memref<32x32xf32, #tpu.memory_space<vmem>>, vector<32x32xf32>
    %cst = arith.constant dense<0.000000e+00> : vector<16x32xf32>
    %2 = tpu.matmul %0, %1, %cst {dimension_numbers = #tpu.dot_dimension_numbers<[1], [0], [0], [1], [0, 0, 1, 1], [], []>} : vector<16x32xf32>, vector<32x32xf32>, vector<16x32xf32> -> vector<16x32xf32>
    %c0_3 = arith.constant 0 : index
    %c0_4 = arith.constant 0 : index
    %3 = vector.load %arg3[%c0_3, %c0_4] : memref<1x32xf32, #tpu.memory_space<vmem>>, vector<1x32xf32>
    %4 = vector.broadcast %3 : vector<1x32xf32> to vector<16x32xf32>
    %5 = arith.addf %2, %4 : vector<16x32xf32>
    %cst_5 = arith.constant 0.000000e+00 : f32
    %6 = vector.broadcast %cst_5 : f32 to vector<16x32xf32>
    %7 = arith.maximumf %5, %6 : vector<16x32xf32>
    %c0_6 = arith.constant 0 : index
    %c0_7 = arith.constant 0 : index
    %8 = vector.load %arg4[%c0_6, %c0_7] : memref<32x32xf32, #tpu.memory_space<vmem>>, vector<32x32xf32>
    %cst_8 = arith.constant dense<0.000000e+00> : vector<16x32xf32>
    %9 = tpu.matmul %7, %8, %cst_8 {dimension_numbers = #tpu.dot_dimension_numbers<[1], [0], [0], [1], [0, 0, 1, 1], [], []>} : vector<16x32xf32>, vector<32x32xf32>, vector<16x32xf32> -> vector<16x32xf32>
    %c0_9 = arith.constant 0 : index
    %c0_10 = arith.constant 0 : index
    %10 = vector.load %arg5[%c0_9, %c0_10] : memref<1x32xf32, #tpu.memory_space<vmem>>, vector<1x32xf32>
    %11 = vector.broadcast %10 : vector<1x32xf32> to vector<16x32xf32>
    %12 = arith.addf %9, %11 : vector<16x32xf32>
    %c0_11 = arith.constant 0 : index
    %c0_12 = arith.constant 0 : index
    %13 = vector.load %arg6[%c0_11, %c0_12] : memref<16x32xf32, #tpu.memory_space<vmem>>, vector<16x32xf32>
    tpu.vector_store %arg6[%c0_11, %c0_12], %12 {strides = array<i32>} : memref<16x32xf32, #tpu.memory_space<vmem>>, vector<16x32xf32>,
    return
  }
  func.func @transform_0(%arg0: i32) -> (i32, i32) {
    %c0_i32 = arith.constant 0 : i32
    %c0_i32_0 = arith.constant 0 : i32
    return %arg0, %c0_i32 : i32, i32
  }
  func.func @transform_1(%arg0: i32) -> (i32, i32) {
    %c0_i32 = arith.constant 0 : i32
    %c0_i32_0 = arith.constant 0 : i32
    %c0_i32_1 = arith.constant 0 : i32
    return %c0_i32, %c0_i32_0 : i32, i32
  }
  func.func @transform_2(%arg0: i32) -> (i32, i32) {
    %c0_i32 = arith.constant 0 : i32
    %c0_i32_0 = arith.constant 0 : i32
    %c0_i32_1 = arith.constant 0 : i32
    return %c0_i32, %c0_i32_0 : i32, i32
  }
  func.func @transform_3(%arg0: i32) -> (i32, i32) {
    %c0_i32 = arith.constant 0 : i32
    %c0_i32_0 = arith.constant 0 : i32
    %c0_i32_1 = arith.constant 0 : i32
    return %c0_i32, %c0_i32_0 : i32, i32
  }
  func.func @transform_4(%arg0: i32) -> (i32, i32) {
    %c0_i32 = arith.constant 0 : i32
    %c0_i32_0 = arith.constant 0 : i32
    %c0_i32_1 = arith.constant 0 : i32
    return %c0_i32, %c0_i32_0 : i32, i32
  }
  func.func @transform_5(%arg0: i32) -> (i32, i32) {
    %c0_i32 = arith.constant 0 : i32
    %c0_i32_0 = arith.constant 0 : i32
    return %arg0, %c0_i32 : i32, i32
  }
}

</mosaic_0001>

<bundles_post_ra>
// kernel: ffn_forward.1
= control target key start
LH: loop header
LB: loop body
LE: loop exit
PB: predicated region body
PF: predicated region fallthrough
CT: control target
= control target key end

     0   :  { %10 = vsyncpa [#allocation3], 0  ;;  %s542_s0 = inlined_call_operand.hbm [shape: f32[16,32], index: 0, kind: input, shape index: {}]   ;;  %s543_s1 = inlined_call_operand.hbm [shape: f32[32,32], index: 1, kind: input, shape index: {}]   ;;  %s544_s2 = inlined_call_operand.vmem [shape: f32[1,32], index: 2, kind: input, shape index: {}]   ;;  %s545_s3 = inlined_call_operand.hbm [shape: f32[32,32], index: 3, kind: input, shape index: {}]   ;;  %s546_s4 = inlined_call_operand.vmem [shape: f32[1,32], index: 4, kind: input, shape index: {}]   ;;  %s547_s5 = inlined_call_operand.hbm [shape: f32[16,32], index: 5, kind: output, shape index: {}]  }
   0x1   :  { %11 = vsyncpa [#allocation6], 0 }
   0x2   :  { %12 = vsyncpa [#allocation4], 0  ;;  %s427_s18 = smov [#allocation5]   ;;  %s428_s20 = smov [#allocation2]  }
   0x3   :  { %s30_s19 = sshll.u32 %s427_s18, 4  ;;  %s18_s21 = sshll.u32 %s428_s20, 4  ;;  %s31_s19 = int_to_ptr.vmem [resolvable:$true] %s30_s19  ;;  %s463_s21 = int_to_ptr.vmem [resolvable:$true] %s18_s21 }
   0x4   :  { %s333_s24 = scalar_lea.hbm %s543_s1, 512 }
   0x5   :  { %p334_p0 = scmp.ne.s32.totalorder %s543_s1, %s333_s24  ;;  %p337_p1 = scmp.lt.u32.totalorder %s333_s24, %s543_s1 }
   0x7   :  { %p339_p2 = pnand %p337_p1, %p334_p0 }
   0x9   :  { %342 = shalt.err (!%p339_p2)
}
   0xa   :  { %s343_s29 = scalar_lea.vmem %s31_s19, 512  ;;  %p348_p4 = scmp.lt.s32.totalorder %s31_s19, %s31_s19 }
   0xb   :  { %p344_p3 = scmp.ne.s32.totalorder %s31_s19, %s343_s29  ;;  %p349_p5 = scmp.lt.s32.totalorder %s343_s29, %s343_s29 }
   0xd   :  { %p350_p6 = por %p349_p5, %p348_p4 }
   0xf   :  { %p351_p7 = pnand %p350_p6, %p344_p3 }
  0x11   :  { %354 = shalt.err (!%p351_p7)
}
  0x12   :  { %s429_s30 = smov 128   ;;  %s430_s6 = smov 8  }
  0x13   :  { %36 = dma.hbm_to_vmem [thread:$0]  %s543_s1, 512, %s31_s19, [#allocation6], %s429_s30, %s429_s30, %s430_s6  }
  0x14   :  { %s355_s11 = scalar_lea.hbm %s542_s0, 256 }
  0x15   :  { %p356_p8 = scmp.ne.s32.totalorder %s542_s0, %s355_s11  ;;  %p359_p9 = scmp.lt.u32.totalorder %s355_s11, %s542_s0 }
  0x17   :  { %p361_p10 = pnand %p359_p9, %p356_p8 }
  0x19   :  { %364 = shalt.err (!%p361_p10)
}
  0x1a   :  { %s365_s16 = scalar_lea.vmem %s463_s21, 256  ;;  %p370_p12 = scmp.lt.s32.totalorder %s463_s21, %s463_s21 }
  0x1b   :  { %p366_p11 = scmp.ne.s32.totalorder %s463_s21, %s365_s16  ;;  %p371_p13 = scmp.lt.s32.totalorder %s365_s16, %s365_s16 }
  0x1d   :  { %p372_p0 = por %p371_p13, %p370_p12 }
  0x1f   :  { %p373_p1 = pnand %p372_p0, %p366_p11 }
  0x21   :  { %376 = shalt.err (!%p373_p1)
}
  0x22   :  { %24 = dma.hbm_to_vmem [thread:$0]  %s542_s0, 256, %s463_s21, [#allocation3], %s429_s30, %s429_s30, %s430_s6  }
  0x23   :  { %s431_s18 = smov [#allocation7]   ;;  %s377_s23 = scalar_lea.hbm %s545_s3, 512 }
  0x24   :  { %s44_s19 = sshll.u32 %s431_s18, 4  ;;  %p378_p2 = scmp.ne.s32.totalorder %s545_s3, %s377_s23  ;;  %s45_s19 = int_to_ptr.vmem [resolvable:$true] %s44_s19 }
  0x25   :  { %p381_p3 = scmp.lt.u32.totalorder %s377_s23, %s545_s3 }
  0x27   :  { %p383_p4 = pnand %p381_p3, %p378_p2 }
  0x29   :  { %386 = shalt.err (!%p383_p4)
}
  0x2a   :  { %s387_s28 = scalar_lea.vmem %s45_s19, 512  ;;  %p392_p6 = scmp.lt.s32.totalorder %s45_s19, %s45_s19 }
  0x2b   :  { %p388_p5 = scmp.ne.s32.totalorder %s45_s19, %s387_s28  ;;  %p393_p7 = scmp.lt.s32.totalorder %s387_s28, %s387_s28 }
  0x2d   :  { %p394_p8 = por %p393_p7, %p392_p6 }
  0x2f   :  { %p395_p9 = pnand %p394_p8, %p388_p5 }
  0x31   :  { %398 = shalt.err (!%p395_p9)
}
  0x32   :  { %50 = dma.hbm_to_vmem [thread:$0]  %s545_s3, 512, %s45_s19, [#allocation6], %s429_s30, %s429_s30, %s430_s6  }
  0x33   :  { %421 = dma.done.wait [#allocation3], 256  }
  0x34   :  { %422 = vsyncadd [#allocation3], 4294967040 }
  0x35   :  { %423 = dma.done.wait [#allocation6], 1024  }
  0x36   :  { %424 = vsyncadd [#allocation6], 4294966272  ;;  %vm75_vm0 = vcmask 261120   ;;  %v64_v0 = vld [vmem:[#allocation5] sm:$0xff]  ;;  %v65_v1 = vld [vmem:[#allocation5 + $0x8] sm:$0xff]  ;;  %s432_s9 = smov [#allocation8]  }
  0x37   :  { %v66_v2 = vld [vmem:[#allocation5 + $0x10] sm:$0xff]  ;;  %v311_v3 = vpack.c.bf16 %v65_v1, %v64_v0  ;;  %v67_v4 = vld [vmem:[#allocation5 + $0x18] sm:$0xff]  ;;  %v159_v7 = vld [vmem:[#allocation7] sm:$0xff]  ;;  %s258_s10 = sshll.u32 %s432_s9, 4  ;;  %s259_s10 = int_to_ptr.vmem [resolvable:$true] %s258_s10 }
  0x38   :  { %v62_v5 = vld [vmem:[#allocation2] sm:$0xff]  ;;  %v315_v6 = vpack.c.bf16 %v67_v4, %v66_v2  ;;  %v160_v8 = vld [vmem:[#allocation7 + $0x8] sm:$0xff]  ;;  %v63_v10 = vld [vmem:[#allocation2 + $0x8] sm:$0xff]  ;;  %p404_p11 = scmp.lt.s32.totalorder %s259_s10, %s259_s10 }
  0x39   :  { %297 = vmatprep.mubr.msk.f32.mxu0 %vm75_vm0, %v62_v5  ;;  %312 = vmatprep.subr.bf16.mxu0 %v311_v3  ;;  %v319_v9 = vpack.c.bf16 %v160_v8, %v159_v7  ;;  %v161_v11 = vld [vmem:[#allocation7 + $0x10] sm:$0xff]  ;;  %v162_v12 = vld [vmem:[#allocation7 + $0x18] sm:$0xff] }
  0x3a   :  { %314 = vmatpush3.bf16.msra.mxu0 %v311_v3  ;;  %v323_v13 = vpack.c.bf16 %v162_v12, %v161_v11  ;;  %v271_v14 = vld [vmem:[%s544_s2] ss:$0 sm:$0xff]  ;;  %s399_s2 = scalar_lea.vmem %s259_s10, 256 }
  0x3b   :  { %316 = vmatprep.subr.bf16.mxu0 %v315_v6  ;;  %320 = vmatprep.subr.bf16.mxu1 %v319_v9  ;;  %v274_v21 = vld [vmem:[%s546_s4] ss:$0 sm:$0xff]  ;;  %p400_p10 = scmp.ne.s32.totalorder %s259_s10, %s399_s2  ;;  %p405_p12 = scmp.lt.s32.totalorder %s399_s2, %s399_s2 }
  0x3c   :  { %322 = vmatpush3.bf16.msra.mxu1 %v319_v9 }
  0x3d   :  { %324 = vmatprep.subr.bf16.mxu1 %v323_v13  ;;  %p406_p13 = por %p405_p12, %p404_p11 }
  0x3e   :  { %318 = vmatpush3.bf16.msra.mxu0 %v315_v6 }
  0x3f   :  { %p407_p0 = pnand %p406_p13, %p400_p10 }
  0x40   :  { %326 = vmatpush3.bf16.msra.mxu1 %v323_v13 }
  0x41   :  { %298 = vmatmul.mubr.msk.f32.vlgmr.msra.gmra.mrb[0].mxu0 %vm75_vm0, %v63_v10 }
 0x114   :  { %v299_v15 = vpop.f32.mrb[0].mxu0 }
 0x115   :  { %v154_v16 = vadd.f32 %v299_v15, %v271_v14  ;;  %v148_v17 = vpop.f32.mrb[1].mxu0 }
 0x116   :  { %v149_v18 = vadd.f32 %v271_v14, %v148_v17 }
 0x117   :  { %v158_v20 = vmax.f32 %v154_v16, 0.0 }
 0x118   :  { %v157_v19 = vmax.f32 %v149_v18, 0.0 }
 0x11a   :  { %308 = vmatprep.mubr.msk.f32.mxu1 %vm75_vm0, %v157_v19 }
 0x11b   :  { %309 = vmatmul.mubr.msk.f32.vlgmr.msra.gmra.mrb[0].mxu1 %vm75_vm0, %v158_v20 }
 0x1ee   :  { %v310_v22 = vpop.f32.mrb[0].mxu1 }
 0x1ef   :  { %v248_v23 = vadd.f32 %v310_v22, %v274_v21  ;;  %v242_v24 = vpop.f32.mrb[1].mxu1 }
 0x1f0   :  { %v243_v25 = vadd.f32 %v274_v21, %v242_v24 }
 0x1f1   :  { %252 = vst.msk [vmem:[#allocation8 + $0x8] sm:$0xff] %vm75_vm0, %v248_v23 }
 0x1f2   :  { %251 = vst.msk [vmem:[#allocation8] sm:$0xff] %vm75_vm0, %v243_v25 }
 0x1f3   :  { %410 = shalt.err (!%p407_p0)
}
 0x1f4   :  { %s411_s12 = scalar_lea.hbm %s547_s5, 256 }
 0x1f5   :  { %p412_p1 = scmp.ne.s32.totalorder %s547_s5, %s411_s12  ;;  %p415_p2 = scmp.lt.u32.totalorder %s411_s12, %s547_s5 }
 0x1f7   :  { %p417_p3 = pnand %p415_p2, %p412_p1 }
 0x1f9   :  { %420 = shalt.err (!%p417_p3)
}
 0x1fa   :  { %264 = dma.vmem_to_hbm [thread:$0]  %s259_s10, 256, %s547_s5, [#allocation4], %s429_s30, %s429_s30, %s430_s6  }
 0x1fb   :  { %425 = dma.done.wait [#allocation4], 256  }
 0x1fc   :  { %426 = vsyncadd [#allocation4], 4294967040 }
 0x1fd   :  { %268 = vsyncpa [#allocation3], 1 }
 0x1fe   :  { %269 = vsyncpa [#allocation6], 1 }
 0x1ff   :  { %270 = vsyncpa [#allocation4], 1 }

</bundles_post_ra>
